<compile_context>
chip_gen: v5e
topology: v5e:2x2
jax: 0.10.0
libtpu: 0.0.40
codegen_flags: <defaults>
</compile_context>

<pallas_src>
import functools

import jax
import jax.numpy as jnp
from jax.experimental import pallas as pl
from jax.experimental.pallas import tpu as pltpu


def _conv_tile(x_ref, w_ref, taps, tile):
    """3x3 'same' conv for one lane tile: (C, 9F) @ (9F, tile) on the MXU."""
    x = x_ref[0]                                            # (F, tile + 2*halo)
    patches = jnp.concatenate([x[:, o:o + tile] for o in taps], axis=0)  # (9F, tile)
    return jnp.dot(w_ref[...], patches, preferred_element_type=jnp.float32)


def _output_block_kernel(x_ref, noisy_ref, interior_ref, w_ref, gamma_ref,
                         beta_ref, out_ref, sum_ref, sqsum_ref,
                         *, taps, tile, eps, inv_count):
    ph = pl.program_id(0)     # 0: accumulate BN statistics, 1: normalize+write
    t = pl.program_id(1)      # lane-tile index over the flattened pixel axis

    acc = _conv_tile(x_ref, w_ref, taps, tile)              # (C, tile) f32

    @pl.when(jnp.logical_and(ph == 0, t == 0))
    def _():
        sum_ref[...] = jnp.zeros_like(sum_ref)
        sqsum_ref[...] = jnp.zeros_like(sqsum_ref)

    @pl.when(ph == 0)
    def _():
        m = interior_ref[...]                               # (1, tile) in {0,1}
        am = acc * m                                        # drop padded pixels
        sum_ref[...] += jnp.sum(am, axis=-1, keepdims=True)
        sqsum_ref[...] += jnp.sum(am * acc, axis=-1, keepdims=True)

    @pl.when(ph == 1)
    def _():
        mean = sum_ref[...] * inv_count                     # (C, 1)
        var = sqsum_ref[...] * inv_count - mean * mean      # biased variance
        scale = jax.lax.rsqrt(var + eps) * gamma_ref[...]
        shift = beta_ref[...] - mean * scale
        y = jnp.maximum(acc * scale + shift, 0.0)           # BN + ReLU
        nz = noisy_ref[...]
        keep = jnp.logical_or(nz == 0.0, nz == 255.0).astype(jnp.float32)
        out_ref[...] = y * keep + nz                        # lane-dense store


def output_block(noisy_images, seconv_output, weight, gamma, beta,
                 eps=1e-5, tile_cols=None, matmul_dtype=jnp.float32):
    """noisy_images: (N,H,W,C) f32; seconv_output: (N,H,W,F) f32;
       weight: (C,F,3,3) f32 (torch OIHW); gamma/beta: (C,).
       matmul_dtype=jnp.bfloat16 halves activation HBM/VMEM on v6e/v7x."""
    n, h, w, c = noisy_images.shape
    f = seconv_output.shape[-1]
    hp, wp = h + 2, w + 2
    p = n * hp * wp                      # padded-flat pixel count
    nhw = n * h * w

    if tile_cols is None:
        tile_cols = 2048                 # big lane tiles amortize per-step cost
    tile_cols = max(128, (int(tile_cols) // 128) * 128)
    num_tiles = pl.cdiv(p, tile_cols)
    p_pad = num_tiles * tile_cols
    halo = wp + 1                        # max |tap shift| in the flat index
    lanes = tile_cols + 2 * halo

    # channels-first, spatially zero-padded, flattened pixel axis on lanes
    x_cf = jnp.pad(jnp.transpose(seconv_output, (3, 0, 1, 2)),
                   ((0, 0), (0, 0), (1, 1), (1, 1)))                  # (F,N,Hp,Wp)
    x_flat = jnp.pad(x_cf.reshape(f, p),
                     ((0, 0), (halo, halo + p_pad - p)))              # (F, p_pad+2h)
    # haloed lane tiles: ~2*halo/tile duplication instead of 9x im2col
    idx = jnp.arange(num_tiles)[:, None] * tile_cols + jnp.arange(lanes)[None, :]
    x_tiles = jnp.transpose(x_flat[:, idx], (1, 0, 2)).astype(matmul_dtype)

    noisy_cf = jnp.pad(jnp.transpose(noisy_images, (3, 0, 1, 2)),
                       ((0, 0), (0, 0), (1, 1), (1, 1)))
    noisy_flat = jnp.pad(noisy_cf.reshape(c, p), ((0, 0), (0, p_pad - p)))

    # interior (real pixel) mask, used only for the BN statistics
    pos = jnp.arange(p_pad)
    q = pos % (hp * wp)
    rh, rw = q // wp, q % wp
    interior = ((pos < p) & (rh >= 1) & (rh <= h) & (rw >= 1) & (rw <= w))
    interior = interior.astype(jnp.float32)[None, :]                  # (1, p_pad)

    # conv weight (C,F,3,3) -> (C, 9F), matching the tap/sublane concat order
    w_mat = jnp.transpose(weight, (0, 2, 3, 1)).reshape(c, 9 * f).astype(matmul_dtype)
    taps = tuple(halo + (kh - 1) * wp + (kw - 1)
                 for kh in range(3) for kw in range(3))

    kernel = functools.partial(_output_block_kernel, taps=taps, tile=tile_cols,
                               eps=float(eps), inv_count=1.0 / float(nhw))

    bytes_accessed = (2 * x_tiles.size * x_tiles.dtype.itemsize       # both phases
                      + noisy_flat.size * 4 + interior.size * 4 + c * p_pad * 4)
    cost = pl.CostEstimate(flops=4 * nhw * 9 * f * c,                 # conv twice
                           transcendentals=0,
                           bytes_accessed=int(bytes_accessed))

    out_flat = pl.pallas_call(
        kernel,
        out_shape=jax.ShapeDtypeStruct((c, p_pad), jnp.float32),
        grid=(2, num_tiles),
        in_specs=[
            # haloed activation tile: needed in both phases
            pl.BlockSpec((1, f, lanes), lambda ph, t: (t, 0, 0)),
            # noisy tile: only touched in phase 1 (ph*t pins the block during
            # phase 0 -> no wasted DMA)
            pl.BlockSpec((c, tile_cols), lambda ph, t: (0, ph * t)),
            # interior mask: only touched in phase 0
            pl.BlockSpec((1, tile_cols), lambda ph, t: (0, (1 - ph) * t)),
            pl.BlockSpec((c, 9 * f), lambda ph, t: (0, 0)),
            pl.BlockSpec((c, 1), lambda ph, t: (0, 0)),
            pl.BlockSpec((c, 1), lambda ph, t: (0, 0)),
        ],
        # output blocks only advance during phase 1 -> no garbage writebacks
        out_specs=pl.BlockSpec((c, tile_cols), lambda ph, t: (0, ph * t)),
        scratch_shapes=[pltpu.VMEM((c, 1), jnp.float32),   # per-channel sum
                        pltpu.VMEM((c, 1), jnp.float32)],  # per-channel sum(x^2)
        compiler_params=pltpu.CompilerParams(
            # Tile axis must stay "arbitrary": BN statistics accumulate in
            # per-core scratch.
            # TODO(synk): a megacore ('parallel') split on v7x needs a
            # cross-core combine of the partial BN sums before phase 1.
            dimension_semantics=("arbitrary", "arbitrary"),
            vmem_limit_bytes=48 * 1024 * 1024),
        cost_estimate=cost,
    )(x_tiles, noisy_flat, interior, w_mat,
      gamma.reshape(c, 1).astype(jnp.float32),
      beta.reshape(c, 1).astype(jnp.float32))

    out = out_flat[:, :p].reshape(c, n, hp, wp)[:, :, 1:1 + h, 1:1 + w]
    return jnp.transpose(out, (1, 2, 3, 0))


def _reference(noisy_images, seconv_output, weight, gamma, beta, eps=1e-5):
    w_hwio = jnp.transpose(weight, (2, 3, 1, 0))
    y = jax.lax.conv_general_dilated(
        seconv_output, w_hwio, window_strides=(1, 1), padding="SAME",
        dimension_numbers=("NHWC", "HWIO", "NHWC"))
    mean = jnp.mean(y, axis=(0, 1, 2), keepdims=True)
    var = jnp.mean((y - mean) ** 2, axis=(0, 1, 2), keepdims=True)
    y = (y - mean) * jax.lax.rsqrt(var + eps) * gamma + beta
    y = jnp.maximum(y, 0.0)
    mask = jnp.logical_or(noisy_images == 0.0,
                          noisy_images == 255.0).astype(jnp.float32)
    return y * mask + noisy_images


if __name__ == "__main__":
    key = jax.random.PRNGKey(0)
    k1, k2, k3, k4, k5 = jax.random.split(key, 5)

    N, H, W = 2, 16, 16
    FILTERS, CHANNELS = 8, 4   # OutputBlock: filters -> channels

    # noisy images with exact 0 / 255 pixels so the mask branch is exercised
    levels = jnp.array([0.0, 17.0, 128.0, 255.0], dtype=jnp.float32)
    noisy = levels[jax.random.randint(k1, (N, H, W, CHANNELS), 0, 4)]
    seconv = jax.random.normal(k2, (N, H, W, FILTERS), dtype=jnp.float32)

    weight = 0.1 * jax.random.normal(k3, (CHANNELS, FILTERS, 3, 3), dtype=jnp.float32)
    gamma = 1.0 + 0.05 * jax.random.normal(k4, (CHANNELS,), dtype=jnp.float32)
    beta = 0.05 * jax.random.normal(k5, (CHANNELS,), dtype=jnp.float32)

    # small tile so the toy size exercises the multi-tile two-phase pipeline;
    # use tile_cols >= 2048 for real image sizes.
    out = output_block(noisy, seconv, weight, gamma, beta, tile_cols=256)
    jax.block_until_ready(out)

    ref = _reference(noisy, seconv, weight, gamma, beta)
    assert out.shape == (N, H, W, CHANNELS)
    err = float(jnp.max(jnp.abs(out - ref)))
    assert jnp.allclose(out, ref, atol=1e-3, rtol=1e-3), f"max abs err {err}"
    print("KERNEL_OK")
</pallas_src>

<mosaic_0001>
module attributes {stable_mosaic.version = 11 : i64} {
  func.func @_output_block_kernel(%arg0: i32, %arg1: i32, %arg2: memref<1x8x294xf32, #tpu.memory_space<vmem>>, %arg3: memref<4x256xf32, #tpu.memory_space<vmem>>, %arg4: memref<1x256xf32, #tpu.memory_space<vmem>>, %arg5: memref<4x72xf32, #tpu.memory_space<vmem>>, %arg6: memref<4x1xf32, #tpu.memory_space<vmem>>, %arg7: memref<4x1xf32, #tpu.memory_space<vmem>>, %arg8: memref<4x256xf32, #tpu.memory_space<vmem>>, %arg9: memref<4x1xf32, #tpu.memory_space<vmem>>, %arg10: memref<4x1xf32, #tpu.memory_space<vmem>>) attributes {dimension_semantics = [#tpu.dimension_semantics<arbitrary>, #tpu.dimension_semantics<arbitrary>], iteration_bounds = array<i64: 2, 3>, scalar_prefetch = 0 : i64, scratch_operands = 2 : i64, tpu.core_type = #tpu.core_type<tc>, window_params = [{transform_indices = @transform_0, window_bounds = array<i64: 1, 8, 294>}, {transform_indices = @transform_1, window_bounds = array<i64: 4, 256>}, {transform_indices = @transform_2, window_bounds = array<i64: 1, 256>}, {pipeline_mode = #tpu.pipeline_mode<synchronous>, transform_indices = @transform_3, window_bounds = array<i64: 4, 72>}, {pipeline_mode = #tpu.pipeline_mode<synchronous>, transform_indices = @transform_4, window_bounds = array<i64: 4, 1>}, {pipeline_mode = #tpu.pipeline_mode<synchronous>, transform_indices = @transform_5, window_bounds = array<i64: 4, 1>}, {transform_indices = @transform_6, window_bounds = array<i64: 4, 256>}]} {
    %c0 = arith.constant 0 : index
    %c0_0 = arith.constant 0 : index
    %c0_1 = arith.constant 0 : index
    %0 = vector.load %arg2[%c0, %c0_0, %c0_1] : memref<1x8x294xf32, #tpu.memory_space<vmem>>, vector<1x8x294xf32>
    %1 = vector.shape_cast %0 : vector<1x8x294xf32> to vector<8x294xf32>
    %2 = vector.extract_strided_slice %1 {offsets = [0, 0], sizes = [8, 256], strides = [1, 1]} : vector<8x294xf32> to vector<8x256xf32>
    %3 = vector.extract_strided_slice %1 {offsets = [0, 1], sizes = [8, 256], strides = [1, 1]} : vector<8x294xf32> to vector<8x256xf32>
    %4 = vector.extract_strided_slice %1 {offsets = [0, 2], sizes = [8, 256], strides = [1, 1]} : vector<8x294xf32> to vector<8x256xf32>
    %5 = vector.extract_strided_slice %1 {offsets = [0, 18], sizes = [8, 256], strides = [1, 1]} : vector<8x294xf32> to vector<8x256xf32>
    %6 = vector.extract_strided_slice %1 {offsets = [0, 19], sizes = [8, 256], strides = [1, 1]} : vector<8x294xf32> to vector<8x256xf32>
    %7 = vector.extract_strided_slice %1 {offsets = [0, 20], sizes = [8, 256], strides = [1, 1]} : vector<8x294xf32> to vector<8x256xf32>
    %8 = vector.extract_strided_slice %1 {offsets = [0, 36], sizes = [8, 256], strides = [1, 1]} : vector<8x294xf32> to vector<8x256xf32>
    %9 = vector.extract_strided_slice %1 {offsets = [0, 37], sizes = [8, 256], strides = [1, 1]} : vector<8x294xf32> to vector<8x256xf32>
    %10 = vector.extract_strided_slice %1 {offsets = [0, 38], sizes = [8, 256], strides = [1, 1]} : vector<8x294xf32> to vector<8x256xf32>
    %11 = tpu.concatenate %2, %3, %4, %5, %6, %7, %8, %9, %10 in 0 : vector<8x256xf32>, vector<8x256xf32>, vector<8x256xf32>, vector<8x256xf32>, vector<8x256xf32>, vector<8x256xf32>, vector<8x256xf32>, vector<8x256xf32>, vector<8x256xf32> -> vector<72x256xf32>
    %c0_2 = arith.constant 0 : index
    %c0_3 = arith.constant 0 : index
    %12 = vector.load %arg5[%c0_2, %c0_3] : memref<4x72xf32, #tpu.memory_space<vmem>>, vector<4x72xf32>
    %cst = arith.constant dense<0.000000e+00> : vector<4x256xf32>
    %13 = tpu.matmul %12, %11, %cst {dimension_numbers = #tpu.dot_dimension_numbers<[1], [0], [0], [1], [0, 0, 1, 1], [], []>} : vector<4x72xf32>, vector<72x256xf32>, vector<4x256xf32> -> vector<4x256xf32>
    %c0_i32 = arith.constant 0 : i32
    %14 = arith.cmpi eq, %arg0, %c0_i32 : i32
    %c0_i32_4 = arith.constant 0 : i32
    %15 = arith.cmpi eq, %arg1, %c0_i32_4 : i32
    %16 = arith.andi %14, %15 : i1
    %17 = arith.extui %16 : i1 to i32
    %c0_i32_5 = arith.constant 0 : i32
    %18 = arith.cmpi ne, %17, %c0_i32_5 : i32
    scf.if %18 {
      %cst_9 = arith.constant 0.000000e+00 : f32
      %25 = vector.broadcast %cst_9 : f32 to vector<4x1xf32>
      %c0_10 = arith.constant 0 : index
      %c0_11 = arith.constant 0 : index
      %26 = vector.load %arg9[%c0_10, %c0_11] : memref<4x1xf32, #tpu.memory_space<vmem>>, vector<4x1xf32>
      tpu.vector_store %arg9[%c0_10, %c0_11], %25 {strides = array<i32>} : memref<4x1xf32, #tpu.memory_space<vmem>>, vector<4x1xf32>,
      %cst_12 = arith.constant 0.000000e+00 : f32
      %27 = vector.broadcast %cst_12 : f32 to vector<4x1xf32>
      %c0_13 = arith.constant 0 : index
      %c0_14 = arith.constant 0 : index
      %28 = vector.load %arg10[%c0_13, %c0_14] : memref<4x1xf32, #tpu.memory_space<vmem>>, vector<4x1xf32>
      tpu.vector_store %arg10[%c0_13, %c0_14], %27 {strides = array<i32>} : memref<4x1xf32, #tpu.memory_space<vmem>>, vector<4x1xf32>,
    } else {
    }
    %c0_i32_6 = arith.constant 0 : i32
    %19 = arith.cmpi eq, %arg0, %c0_i32_6 : i32
    %20 = arith.extui %19 : i1 to i32
    %c0_i32_7 = arith.constant 0 : i32
    %21 = arith.cmpi ne, %20, %c0_i32_7 : i32
    scf.if %21 {
      %c0_9 = arith.constant 0 : index
      %c0_10 = arith.constant 0 : index
      %25 = vector.load %arg4[%c0_9, %c0_10] : memref<1x256xf32, #tpu.memory_space<vmem>>, vector<1x256xf32>
      %26 = vector.broadcast %25 : vector<1x256xf32> to vector<4x256xf32>
      %27 = arith.mulf %13, %26 : vector<4x256xf32>
      %c0_11 = arith.constant 0 : index
      %c0_12 = arith.constant 0 : index
      %28 = vector.load %arg9[%c0_11, %c0_12] : memref<4x1xf32, #tpu.memory_space<vmem>>, vector<4x1xf32>
      %cst_13 = arith.constant dense<0.000000e+00> : vector<4xf32>
      %29 = vector.multi_reduction <add>, %27, %cst_13 [1] : vector<4x256xf32> to vector<4xf32>
      %30 = vector.shape_cast %29 : vector<4xf32> to vector<4x1xf32>
      %31 = arith.addf %28, %30 : vector<4x1xf32>
      %c0_14 = arith.constant 0 : index
      %c0_15 = arith.constant 0 : index
      %32 = vector.load %arg9[%c0_14, %c0_15] : memref<4x1xf32, #tpu.memory_space<vmem>>, vector<4x1xf32>
      tpu.vector_store %arg9[%c0_14, %c0_15], %31 {strides = array<i32>} : memref<4x1xf32, #tpu.memory_space<vmem>>, vector<4x1xf32>,
      %c0_16 = arith.constant 0 : index
      %c0_17 = arith.constant 0 : index
      %33 = vector.load %arg10[%c0_16, %c0_17] : memref<4x1xf32, #tpu.memory_space<vmem>>, vector<4x1xf32>
      %34 = arith.mulf %27, %13 : vector<4x256xf32>
      %cst_18 = arith.constant dense<0.000000e+00> : vector<4xf32>
      %35 = vector.multi_reduction <add>, %34, %cst_18 [1] : vector<4x256xf32> to vector<4xf32>
      %36 = vector.shape_cast %35 : vector<4xf32> to vector<4x1xf32>
      %37 = arith.addf %33, %36 : vector<4x1xf32>
      %c0_19 = arith.constant 0 : index
      %c0_20 = arith.constant 0 : index
      %38 = vector.load %arg10[%c0_19, %c0_20] : memref<4x1xf32, #tpu.memory_space<vmem>>, vector<4x1xf32>
      tpu.vector_store %arg10[%c0_19, %c0_20], %37 {strides = array<i32>} : memref<4x1xf32, #tpu.memory_space<vmem>>, vector<4x1xf32>,
    } else {
    }
    %c1_i32 = arith.constant 1 : i32
    %22 = arith.cmpi eq, %arg0, %c1_i32 : i32
    %23 = arith.extui %22 : i1 to i32
    %c0_i32_8 = arith.constant 0 : i32
    %24 = arith.cmpi ne, %23, %c0_i32_8 : i32
    scf.if %24 {
      %c0_9 = arith.constant 0 : index
      %c0_10 = arith.constant 0 : index
      %25 = vector.load %arg9[%c0_9, %c0_10] : memref<4x1xf32, #tpu.memory_space<vmem>>, vector<4x1xf32>
      %cst_11 = arith.constant 0.001953125 : f32
      %26 = vector.broadcast %cst_11 : f32 to vector<4x1xf32>
      %27 = arith.mulf %25, %26 : vector<4x1xf32>
      %c0_12 = arith.constant 0 : index
      %c0_13 = arith.constant 0 : index
      %28 = vector.load %arg10[%c0_12, %c0_13] : memref<4x1xf32, #tpu.memory_space<vmem>>, vector<4x1xf32>
      %cst_14 = arith.constant 0.001953125 : f32
      %29 = vector.broadcast %cst_14 : f32 to vector<4x1xf32>
      %30 = arith.mulf %28, %29 : vector<4x1xf32>
      %31 = arith.mulf %27, %27 : vector<4x1xf32>
      %32 = arith.subf %30, %31 : vector<4x1xf32>
      %cst_15 = arith.constant 9.99999974E-6 : f32
      %33 = vector.broadcast %cst_15 : f32 to vector<4x1xf32>
      %34 = arith.addf %32, %33 : vector<4x1xf32>
      %35 = math.rsqrt %34 : vector<4x1xf32>
      %c0_16 = arith.constant 0 : index
      %c0_17 = arith.constant 0 : index
      %36 = vector.load %arg6[%c0_16, %c0_17] : memref<4x1xf32, #tpu.memory_space<vmem>>, vector<4x1xf32>
      %37 = arith.mulf %35, %36 : vector<4x1xf32>
      %c0_18 = arith.constant 0 : index
      %c0_19 = arith.constant 0 : index
      %38 = vector.load %arg7[%c0_18, %c0_19] : memref<4x1xf32, #tpu.memory_space<vmem>>, vector<4x1xf32>
      %39 = arith.mulf %27, %37 : vector<4x1xf32>
      %40 = arith.subf %38, %39 : vector<4x1xf32>
      %41 = vector.broadcast %37 : vector<4x1xf32> to vector<4x256xf32>
      %42 = arith.mulf %13, %41 : vector<4x256xf32>
      %43 = vector.broadcast %40 : vector<4x1xf32> to vector<4x256xf32>
      %44 = arith.addf %42, %43 : vector<4x256xf32>
      %cst_20 = arith.constant 0.000000e+00 : f32
      %45 = vector.broadcast %cst_20 : f32 to vector<4x256xf32>
      %46 = arith.maximumf %44, %45 : vector<4x256xf32>
      %c0_21 = arith.constant 0 : index
      %c0_22 = arith.constant 0 : index
      %47 = vector.load %arg3[%c0_21, %c0_22] : memref<4x256xf32, #tpu.memory_space<vmem>>, vector<4x256xf32>
      %cst_23 = arith.constant 0.000000e+00 : f32
      %48 = vector.broadcast %cst_23 : f32 to vector<4x256xf32>
      %49 = arith.cmpf oeq, %47, %48 : vector<4x256xf32>
      %cst_24 = arith.constant 2.550000e+02 : f32
      %50 = vector.broadcast %cst_24 : f32 to vector<4x256xf32>
      %51 = arith.cmpf oeq, %47, %50 : vector<4x256xf32>
      %52 = arith.ori %49, %51 : vector<4x256xi1>
      %53 = arith.extui %52 : vector<4x256xi1> to vector<4x256xi32>
      %54 = arith.sitofp %53 : vector<4x256xi32> to vector<4x256xf32>
      %55 = arith.mulf %46, %54 : vector<4x256xf32>
      %56 = arith.addf %55, %47 : vector<4x256xf32>
      %c0_25 = arith.constant 0 : index
      %c0_26 = arith.constant 0 : index
      %57 = vector.load %arg8[%c0_25, %c0_26] : memref<4x256xf32, #tpu.memory_space<vmem>>, vector<4x256xf32>
      tpu.vector_store %arg8[%c0_25, %c0_26], %56 {strides = array<i32>} : memref<4x256xf32, #tpu.memory_space<vmem>>, vector<4x256xf32>,
    } else {
    }
    return
  }
  func.func @transform_0(%arg0: i32, %arg1: i32) -> (i32, i32, i32) {
    %c0_i32 = arith.constant 0 : i32
    %c0_i32_0 = arith.constant 0 : i32
    %c0_i32_1 = arith.constant 0 : i32
    return %arg1, %c0_i32, %c0_i32_0 : i32, i32, i32
  }
  func.func @transform_1(%arg0: i32, %arg1: i32) -> (i32, i32) {
    %0 = arith.muli %arg0, %arg1 : i32
    %c0_i32 = arith.constant 0 : i32
    %c0_i32_0 = arith.constant 0 : i32
    return %c0_i32, %0 : i32, i32
  }
  func.func @transform_2(%arg0: i32, %arg1: i32) -> (i32, i32) {
    %c1_i32 = arith.constant 1 : i32
    %0 = arith.subi %c1_i32, %arg0 : i32
    %1 = arith.muli %0, %arg1 : i32
    %c0_i32 = arith.constant 0 : i32
    %c0_i32_0 = arith.constant 0 : i32
    return %c0_i32, %1 : i32, i32
  }
  func.func @transform_3(%arg0: i32, %arg1: i32) -> (i32, i32) {
    %c0_i32 = arith.constant 0 : i32
    %c0_i32_0 = arith.constant 0 : i32
    %c0_i32_1 = arith.constant 0 : i32
    return %c0_i32, %c0_i32_0 : i32, i32
  }
  func.func @transform_4(%arg0: i32, %arg1: i32) -> (i32, i32) {
    %c0_i32 = arith.constant 0 : i32
    %c0_i32_0 = arith.constant 0 : i32
    %c0_i32_1 = arith.constant 0 : i32
    return %c0_i32, %c0_i32_0 : i32, i32
  }
  func.func @transform_5(%arg0: i32, %arg1: i32) -> (i32, i32) {
    %c0_i32 = arith.constant 0 : i32
    %c0_i32_0 = arith.constant 0 : i32
    %c0_i32_1 = arith.constant 0 : i32
    return %c0_i32, %c0_i32_0 : i32, i32
  }
  func.func @transform_6(%arg0: i32, %arg1: i32) -> (i32, i32) {
    %0 = arith.muli %arg0, %arg1 : i32
    %c0_i32 = arith.constant 0 : i32
    %c0_i32_0 = arith.constant 0 : i32
    return %c0_i32, %0 : i32, i32
  }
}

</mosaic_0001>

<bundles_post_ra>
// kernel: tpu_custom_call.1
= control target key start
LH: loop header
LB: loop body
LE: loop exit
PB: predicated region body
PF: predicated region fallthrough
CT: control target
= control target key end

     0   :  { %s1447_s0 = inlined_call_operand.hbm [shape: f32[3,8,294], index: 0, kind: input, shape index: {}]   ;;  %s1448_s1 = inlined_call_operand.hbm [shape: f32[4,768], index: 1, kind: input, shape index: {}]   ;;  %s1449_s2 = inlined_call_operand.vmem [shape: f32[1,768], index: 2, kind: input, shape index: {}]   ;;  %s1450_s3 = inlined_call_operand.vmem [shape: f32[4,72], index: 3, kind: input, shape index: {}]   ;;  %s1451_s4 = inlined_call_operand.vmem [shape: f32[4,1], index: 4, kind: input, shape index: {}]   ;;  %s1452_s5 = inlined_call_operand.vmem [shape: f32[4,1], index: 5, kind: input, shape index: {}]   ;;  %s1453_s6 = inlined_call_operand.hbm [shape: f32[4,768], index: 6, kind: output, shape index: {}]  }
   0x1   :  { %1461 = sst [smem:[#allocation21_spill]] %s1447_s0 }
   0x2   :  { %11 = vsyncpa [#allocation5], 0 }
   0x3   :  { %13 = vsyncpa [#allocation5 + $0x1], 0 }
   0x4   :  { %14 = vsyncpa [#allocation8], 0 }
   0x5   :  { %16 = vsyncpa [#allocation8 + $0x1], 0 }
   0x6   :  { %17 = vsyncpa [#allocation6], 0 }
   0x7   :  { %19 = vsyncpa [#allocation6 + $0x1], 0  ;;  %s1167_s21 = smov 0   ;;  %s1169_s22 = smov 0  }
   0x8   :  { %s1171_s23 = smov 0   ;;  %s1173_s24 = smov 0  }
   0x9   :  { %s1175_s25 = smov 0   ;;  %s1177_s26 = smov 0  }
   0xa   :  { %s1179_s27 = smov 0   ;;  %s1181_s28 = smov 0  }
   0xb   :  { %s1183_s29 = smov 0   ;;  %s1185_s30 = smov 0  }
   0xc   :  { %s1187_s7 = smov 0  }
   0xd LB: > { %1462 = sst [smem:[#allocation13_spill]] %s1079_s21  ;;  %s1454_s8 = sadd.s32 4294967295, %s1119_s7   ;;  %s1119_s7 = sphi %s1187_s7, %s25_s7   ;;  %s1115_s30 = sphi %s1185_s30, %s1488_s30   ;;  %s1111_s29 = sphi %s1183_s29, %s1487_s29   ;;  %s1107_s28 = sphi %s1181_s28, %s1486_s28   ;;  %s1103_s27 = sphi %s1179_s27, %s1485_s27   ;;  %s1099_s26 = sphi %s1177_s26, %s1484_s26   ;;  %s1095_s25 = sphi %s1175_s25, %s1493_s25   ;;  %s1091_s24 = sphi %s1173_s24, %s1492_s24   ;;  %s1087_s23 = sphi %s1171_s23, %s1491_s23   ;;  %s1083_s22 = sphi %s1169_s22, %s1490_s22   ;;  %s1079_s21 = sphi %s1167_s21, %s1489_s21  }
   0xe   : > { %1463 = sst [smem:[#allocation14_spill]] %s1099_s26  ;;  %s34_s9 = sadd.s32 1, %s1111_s29 }
   0xf   : > { %1464 = sst [smem:[#allocation15_spill]] %s1111_s29  ;;  %p1222_p0 = scmp.ge.s32.totalorder %s34_s9, 3 }
  0x10   : > { %1465 = sst [smem:[#allocation16_spill]] %s1115_s30  ;;  %p51_p1 = scmp.ne.s32.totalorder %s1099_s26, %s1095_s25 }
  0x11   : > { %p52_p2 = scmp.eq.s32.totalorder %s1119_s7, 0  ;;  %p57_p3 = scmp.ne.s32.totalorder %s1095_s25, %s1091_s24 }
  0x12   : > { %p1233_p4 = scmp.eq.s32.totalorder %s1454_s8, 0  ;;  %p789_p7 = scmp.lt.s32.totalorder %s1119_s7, 6 }
  0x13   : > { %p53_p5 = por %p52_p2, %p51_p1  ;;  %s239_s14 = sand.u32 1, %s1099_s26  }
  0x14   : > { %p1241_p6 = por %p1233_p4, %p57_p3  ;;  %s770_s15 = smul.u32 24, %s1111_s29 }
  0x15   : > { %s769_s16 = smul.u32 24, %s239_s14  ;;  %s1469_s0 = sld [smem:[#allocation21_spill]] }
  0x16   : > { %p779_p8 = pnand %p789_p7, %p53_p5  ;;  %s240_s11 = scalar_lea.sflag [#allocation5], %s239_s14 }
  0x17   : > { %s243_s24 = scalar_lea.vmem [#allocation4], %s769_s16  ;;  %p753_p9 = scmp.ge.s32.totalorder %s1119_s7, 1 }
  0x18   : > { %s252_s8 = sshll.u32 %s243_s24, 4  ;;  %p290_p10 = scmp.lt.s32.totalorder %s1119_s7, 7  ;;  %s253_s8 = int_to_ptr.vmem [resolvable:$true] %s252_s8 }
  0x19   : > { %s746_s17 = sadd.s32 4294967294, %s1119_s7   ;;  %s1495_s9 = smov (%p1222_p0, %s34_s9), 0 }
  0x1a   : > { %p1255_p11 = pnand %p753_p9, %p290_p10  ;;  %1471 = sst [smem:[#allocation17_spill]] %s1495_s9 }
  0x1b   : > { %s248_s19 = scalar_lea.hbm %s1469_s0, %s770_s15  ;;  %s37_s16 = sadd.s32 1, %s1115_s30 }
  0x1c   : > { %s250_s20 = sshll.u32 %s248_s19, 4  ;;  %s67_s14 = smul.u32 %s1111_s29, %s1115_s30  ;;  %s251_s20 = int_to_ptr.hbm [resolvable:$true] %s250_s20 }
  0x1d   : > { %781 = dma.hbm_to_vmem [thread:$0]  (!%p779_p8), %s251_s20, 384, %s253_s8, %s240_s11  }
  0x1e   : > { %s1497_s16 = smov (!%p1222_p0, %s37_s16), %s1115_s30  ;;  %s41_s8 = ssub.s32 %s1111_s29, %s1495_s9 }
  0x1f   : > { %s72_s11 = sadd.s32 1, %s1087_s23  ;;  %p39_p12 = scmp.ge.s32.totalorder %s1497_s16, 2 }
  0x20   : > { %p42_p13 = scmp.eq.s32.totalorder %s41_s8, 0  ;;  %p79_p1 = scmp.ne.s32.totalorder %s1087_s23, %s1083_s22 }
  0x21   : > { %p85_p3 = scmp.ne.s32.totalorder %s1083_s22, %s1079_s21  ;;  %s1499_s16 = smov (%p39_p12, %s1497_s16), 0 }
  0x22   : > { %1472 = sst [smem:[#allocation18_spill]] %s1499_s16  ;;  %s1473_s18 = sadd.s32 1, %s1099_s26 }
  0x23   : > { %s1282_s19 = scalar_select %p42_p13, %s1099_s26, %s1473_s18  }
  0x24   : > { %s68_s20 = smul.u32 %s1499_s16, %s1495_s9  ;;  %p1288_p5 = por %p79_p1, %p52_p2 }
  0x25   : > { %1474 = sst [smem:[#allocation19_spill]] %s1282_s19  ;;  %p1294_p0 = por %p85_p3, %p1233_p4 }
  0x26   : > { %s1477_s8 = sadd.s32 4294967295, %s1119_s7   ;;  %s69_s0 = ssub.s32 %s67_s14, %s68_s20 }
  0x27   : > { %p204_p8 = scmp.eq.s32.totalorder %s1477_s8, 5  ;;  %p210_p9 = scmp.eq.s32.totalorder %s746_s17, 5 }
  0x28   : > { %p70_p10 = scmp.eq.s32.totalorder %s69_s0, 0  ;;  %s259_s12 = sand.u32 1, %s1087_s23  }
  0x29   : > { %p1300_p12 = por %p204_p8, %p79_p1  ;;  %p1304_p2 = por %p210_p9, %p85_p3 }
  0x2a   : > { %s1310_s9 = scalar_select %p70_p10, %s1087_s23, %s72_s11  }
  0x2b   : > { %s750_s30 = sshll.u32 %s259_s12, 3  ;;  %s767_s29 = sshll.u32 %s67_s14, 3 }
  0x2c   : > { %1480 = sst [smem:[#allocation20_spill]] %s1310_s9  ;;  %s269_s26 = scalar_lea.hbm %s1448_s1, %s767_s29 }
  0x2d   : > { %s263_s20 = scalar_lea.vmem [#allocation7], %s750_s30  ;;  %s271_s0 = sshll.u32 %s269_s26, 4  ;;  %s272_s0 = int_to_ptr.hbm [resolvable:$true] %s271_s0 }
  0x2e   : > { %s273_s17 = sshll.u32 %s263_s20, 4  ;;  %p782_p4 = pnand %p789_p7, %p1288_p5  ;;  %s274_s17 = int_to_ptr.vmem [resolvable:$true] %s273_s17 }
  0x2f   : > { %s260_s21 = scalar_lea.sflag [#allocation8], %s259_s12  ;;  %294 = sbr.rel (%p1255_p11) target bundleno = 679 (0x2a7), region = 44 }
  0x30   : > { %784 = dma.hbm_to_vmem [thread:$0]  (!%p782_p4), %s272_s0, 128, %s274_s17, %s260_s21  }
  0x31   : > { %s296_s14 = sand.u32 (!%p1255_p11), 1, %s1095_s25  }
  0x32   : > { %s771_s11 = smul.u32 (!%p1255_p11), 24, %s296_s14  ;;  %s297_s9 = scalar_lea.sflag (!%p1255_p11), [#allocation5], %s296_s14 }
  0x34   : > { %s300_s19 = scalar_lea.vmem [#allocation4], %s771_s11 }
  0x35   : > { %1066 = dma.done.wait (%p1241_p6), %s297_s9, 384  }
  0x36   : > { %1068 = vsyncadd (%p1241_p6), %s297_s9, 4294966912  ;;  %s1327_s26 = sand.u32 1, %s1083_s22  }
  0x37   : > { %s754_s21 = sshll.u32 %s1327_s26, 3  ;;  %s307_s29 = scalar_lea.sflag [#allocation8], %s1327_s26 }
  0x38   : > { %s1333_s30 = scalar_lea.vmem [#allocation7], %s754_s21 }
  0x39   : > { %1070 = dma.done.wait (%p1294_p0), %s307_s29, 128  }
  0x3a   : > { %1072 = vsyncadd (%p1294_p0), %s307_s29, 4294967168  ;;  %s353_s9 = ssub.s32 1, %s1107_s28  ;;  %v1341_v0 = vld [vmem:[%s300_s19] sm:$0xff]  ;;  %v1343_v1 = vld [vmem:[%s300_s19 + $0x8] sm:$0xff]  ;;  %s1121_s24 = smov 91   ;;  %vm453_vm0 = vcmask 736256  }
  0x3b   : > { %s354_s13 = smul.u32 %s1103_s27, %s353_s9  ;;  %v895_v2 = vpack.i.bf16 %v1343_v1, %v1341_v0  ;;  %s1122_s12 = smov 90   ;;  %v366_v3 = vld [vmem:[%s300_s19 + $0x10] sm:$0xff]  ;;  %vm442_vm1 = vcmask 744448   ;;  %vm431_vm2 = vcmask 752640   ;;  %vm420_vm3 = vcmask 883712  }
  0x3c   : > { %s1123_s10 = smov 92   ;;  %s1124_s0 = smov 108   ;;  %vm409_vm4 = vcmask 891904   ;;  %vm398_vm5 = vcmask 900096   ;;  %vm387_vm6 = vcmask 1031168   ;;  %vm376_vm7 = vcmask 1039360  }
  0x3d   : > { %s756_s15 = sshll.u32 %s354_s13, 1  ;;  %896 = vrot.lane.b32.xlu1 %v895_v2, %s1121_s24  ;;  %891 = vrot.lane.b32.xlu0 %v895_v2, %s1122_s12  ;;  %s1125_s14 = smov 109   ;;  %v458_v50 = vld [vmem:[%s1450_s3] sm:$0xf]  ;;  %vm459_vm8 = vcmask 588800  }
  0x3e   : > { %p356_p6 = scmp.lt.s32.totalorder %s756_s15, 5  ;;  %901 = vrot.lane.b32.xlu2 %v895_v2, %s1123_s10  ;;  %s1126_s11 = smov 110  }
  0x3f   : > { %s1127_s29 = smov 126   ;;  %s1128_s9 = smov 127  }
  0x40   : > { %s1501_s15 = smov (!%p356_p6, %s756_s15), 5  ;;  %p503_p7 = scmp.eq.s32.totalorder %s1107_s28, 0 }
  0x41   : > { %s358_s17 = scalar_lea.vmem %s1449_s2, %s1501_s15  ;;  %p504_p11 = scmp.eq.s32.totalorder %s1103_s27, 0 }
  0x43   : > { %p505_p13 = pnand %p504_p11, %p503_p7 }
  0x45   : > { %440 = vrot.lane.b32.xlu1 %v366_v3, %s1121_s24  ;;  %451 = vrot.lane.b32.xlu0 %v366_v3, %s1122_s12  ;;  %s1370_s24 = scalar_lea.vmem [#allocation9], %s754_s21 }
  0x46   : > { %429 = vrot.lane.b32.xlu2 %v366_v3, %s1123_s10 }
  0x4d   : > { %906 = vrot.lane.b32.xlu0 %v895_v2, %s1124_s0  ;;  %418 = vrot.lane.b32.xlu1 %v366_v3, %s1124_s0 }
  0x4e   : > { %911 = vrot.lane.b32.xlu2 %v895_v2, %s1125_s14 }
  0x55   : > { %407 = vrot.lane.b32.xlu0 %v366_v3, %s1125_s14  ;;  %916 = vrot.lane.b32.xlu1 %v895_v2, %s1126_s11 }
  0x56   : > { %396 = vrot.lane.b32.xlu2 %v366_v3, %s1126_s11 }
  0x5d   : > { %921 = vrot.lane.b32.xlu0 %v895_v2, %s1127_s29  ;;  %385 = vrot.lane.b32.xlu1 %v366_v3, %s1127_s29 }
  0x5e   : > { %926 = vrot.lane.b32.xlu2 %v895_v2, %s1128_s9 }
  0x65   : > { %374 = vrot.lane.b32.xlu0 %v366_v3, %s1128_s9 }
  0x98   : > { %v902_v4 = vpop.permute.xlu2 %901 }
  0x99   : > { %v904_v6 = vunpack.i.h.bf16 %v902_v4  ;;  %v903_v7 = vunpack.i.l.bf16 %v902_v4 }
  0x9b   : > { %v432_v16 = vsel %vm431_vm2, %v903_v7, %v904_v6 }
  0xa0   : > { %v430_v5 = vpop.permute.xlu2 %429 }
  0xa1   : > { %v433_v22 = vsel %vm431_vm2, %v904_v6, %v430_v5 }
  0xa8   : > { %v912_v17 = vpop.permute.xlu2 %911 }
  0xa9   : > { %v914_v23 = vunpack.i.h.bf16 %v912_v17  ;;  %v913_v24 = vunpack.i.l.bf16 %v912_v17 }
  0xab   : > { %v410_v32 = vsel %vm409_vm4, %v913_v24, %v914_v23 }
  0xaf   : > { %v897_v8 = vpop.permute.xlu1 %896  ;;  %v892_v9 = vpop.permute.xlu0 %891 }
  0xb0   : > { %v899_v10 = vunpack.i.h.bf16 %v897_v8  ;;  %v898_v11 = vunpack.i.l.bf16 %v897_v8  ;;  %v894_v12 = vunpack.i.h.bf16 %v892_v9  ;;  %v893_v13 = vunpack.i.l.bf16 %v892_v9  ;;  %v397_v29 = vpop.permute.xlu2 %396 }
  0xb2   : > { %v454_v14 = vsel %vm453_vm0, %v893_v13, %v894_v12  ;;  %v443_v15 = vsel %vm442_vm1, %v898_v11, %v899_v10 }
  0xb3   : > { %470 = vmatpush.msra.mxu0 %v454_v14 }
  0xb5   : > { %471 = vmatpush.msra.mxu0 %v443_v15 }
  0xb7   : > { %v441_v18 = vpop.permute.xlu1 %440  ;;  %v452_v19 = vpop.permute.xlu0 %451  ;;  %472 = vmatpush.msra.mxu0 %v432_v16 }
  0xb8   : > { %v455_v20 = vsel %vm453_vm0, %v894_v12, %v452_v19  ;;  %v444_v21 = vsel %vm442_vm1, %v899_v10, %v441_v18  ;;  %v927_v40 = vpop.permute.xlu2 %926 }
  0xb9   : > { %490 = vmatpush.msra.mxu1 %v455_v20  ;;  %v929_v41 = vunpack.i.h.bf16 %v927_v40  ;;  %v928_v42 = vunpack.i.l.bf16 %v927_v40 }
  0xbb   : > { %491 = vmatpush.msra.mxu1 %v444_v21  ;;  %v377_v49 = vsel %vm376_vm7, %v928_v42, %v929_v41 }
  0xbd   : > { %492 = vmatpush.msra.mxu1 %v433_v22 }
  0xbf   : > { %v907_v25 = vpop.permute.xlu0 %906  ;;  %v419_v26 = vpop.permute.xlu1 %418 }
  0xc0   : > { %v909_v27 = vunpack.i.h.bf16 %v907_v25  ;;  %v908_v28 = vunpack.i.l.bf16 %v907_v25 }
  0xc2   : > { %v421_v30 = vsel %vm420_vm3, %v908_v28, %v909_v27  ;;  %v422_v31 = vsel %vm420_vm3, %v909_v27, %v419_v26 }
  0xc3   : > { %473 = vmatpush.msra.mxu0 %v421_v30  ;;  %493 = vmatpush.msra.mxu1 %v422_v31 }
  0xc5   : > { %474 = vmatpush.msra.mxu0 %v410_v32 }
  0xc7   : > { %v408_v33 = vpop.permute.xlu0 %407  ;;  %v917_v34 = vpop.permute.xlu1 %916 }
  0xc8   : > { %v919_v35 = vunpack.i.h.bf16 %v917_v34  ;;  %v918_v36 = vunpack.i.l.bf16 %v917_v34  ;;  %v411_v37 = vsel %vm409_vm4, %v914_v23, %v408_v33 }
  0xc9   : > { %494 = vmatpush.msra.mxu1 %v411_v37 }
  0xca   : > { %v400_v38 = vsel %vm398_vm5, %v919_v35, %v397_v29  ;;  %v399_v39 = vsel %vm398_vm5, %v918_v36, %v919_v35 }
  0xcb   : > { %495 = vmatpush.msra.mxu1 %v400_v38  ;;  %475 = vmatpush.msra.mxu0 %v399_v39 }
  0xcf   : > { %v922_v43 = vpop.permute.xlu0 %921  ;;  %v386_v44 = vpop.permute.xlu1 %385 }
  0xd0   : > { %v924_v45 = vunpack.i.h.bf16 %v922_v43  ;;  %v923_v46 = vunpack.i.l.bf16 %v922_v43 }
  0xd2   : > { %v388_v47 = vsel %vm387_vm6, %v923_v46, %v924_v45  ;;  %v389_v48 = vsel %vm387_vm6, %v924_v45, %v386_v44 }
  0xd3   : > { %476 = vmatpush.msra.mxu0 %v388_v47  ;;  %496 = vmatpush.msra.mxu1 %v389_v48 }
  0xd5   : > { %477 = vmatpush.msra.mxu0 %v377_v49 }
  0xd7   : > { %v375_v51 = vpop.permute.xlu0 %374  ;;  %478 = vmatpush.msra.mxu0 %v1341_v0 }
  0xd8   : > { %v378_v52 = vsel %vm376_vm7, %v929_v41, %v375_v51  ;;  %757 = vmatmul.msk.f32.vlgmr.msra.gmra.mxu0 %vm459_vm8, %v458_v50 }
  0xd9   : > { %497 = vmatpush.msra.mxu1 %v378_v52 }
  0xdb   : > { %498 = vmatpush.msra.mxu1 %v1343_v1 }
  0xdc   : > { %758 = vmatmul.msk.f32.vlgmr.msra.gmra.mxu1 %vm459_vm8, %v458_v50 }
 0x155   : > { %v1364_v53 = vpop.f32.mrf.mxu0  ;;  %508 = sbr.rel (%p505_p13) target bundleno = 349 (0x15d), region = 56 }
 0x159   : > { %v1366_v54 = vpop.f32.mrf.mxu1 }
 0x15a   : > { %vm509_vm9 = vcmask 3072   ;;  %v1129_v55 = vmov 0.0  }
 0x15b   : > { %510 = vst.msk [vmem:[#allocation2] sm:$0xf] %vm509_vm9, %v1129_v55 }
 0x15c   : > { %511 = vst.msk [vmem:[#allocation3] sm:$0xf] %vm509_vm9, %v1129_v55 }
 0x15d PF: > { %p759_p1 = scmp.ne.s32.totalorder %s1107_s28, 0 }
 0x15f   : > { %514 = sbr.rel (%p759_p1) target bundleno = 491 (0x1eb), region = 60 }
 0x164   : > { %v515_v56 = vld [vmem:[%s358_s17] sm:$0x3]  ;;  %vm524_vm10 = vcmask 1043456   ;;  %v523_v5 = vld [vmem:[#allocation2] sm:$0xf]  ;;  %vm531_vm11 = vcmask 3072  }
 0x165   : > { %v517_v57 = vperm.slane %v515_v56, 0  ;;  %v518_v58 = vperm.slane %v515_v56, 1  ;;  %v533_v8 = vld [vmem:[#allocation3] sm:$0xf] }
 0x167   : > { %v521_v59 = vmul.f32 %v517_v57, %v1364_v53  ;;  %v522_v60 = vmul.f32 %v518_v58, %v1366_v54 }
 0x169   : > { %v525_v61 = vsel %vm524_vm10, %v521_v59, 0.0  ;;  %v526_v62 = vsel %vm524_vm10, %v522_v60, 0.0  ;;  %v534_v63 = vmul.f32 %v521_v59, %v1364_v53  ;;  %v535_v0 = vmul.f32 %v522_v60, %v1366_v54 }
 0x16a   : > { %v527_v1 = vadd.f32 %v526_v62, %v525_v61 }
 0x16b   : > { %v536_v2 = vsel %vm524_vm10, %v534_v63, 0.0  ;;  %v537_v3 = vsel %vm524_vm10, %v535_v0, 0.0 }
 0x16c   : > { %528 = vadd.xlane.f32.xlu0 %v527_v1  ;;  %v538_v4 = vadd.f32 %v537_v3, %v536_v2 }
 0x174   : > { %539 = vadd.xlane.f32.xlu0 %v538_v4 }
 0x1df   : > { %v529_v6 = vpop.xlane.xlu0 %528 }
 0x1e0   : > { %v530_v7 = vadd.f32 %v529_v6, %v523_v5 }
 0x1e2   : > { %532 = vst.msk [vmem:[#allocation2] sm:$0xf] %vm531_vm11, %v530_v7 }
 0x1e7   : > { %v540_v9 = vpop.xlane.xlu0 %539 }
 0x1e8   : > { %v541_v10 = vadd.f32 %v540_v9, %v533_v8 }
 0x1ea   : > { %542 = vst.msk [vmem:[#allocation3] sm:$0xf] %vm531_vm11, %v541_v10 }
 0x1eb PF: > { %p760_p3 = scmp.ne.s32.totalorder %s1107_s28, 1 }
 0x1ed   : > { %546 = sbr.rel (%p760_p3) target bundleno = 662 (0x296), region = 64 }
 0x1f2   : > { %v547_v11 = vld [vmem:[#allocation2] sm:$0xf]  ;;  %v549_v12 = vld [vmem:[#allocation3] sm:$0xf]  ;;  %v1130_v13 = vmov 0   ;;  %v1131_v32 = vmov 0.0  }
 0x1f3   : > { %930 = vset.pattern.permute.xlu0 %v1130_v13  ;;  %v548_v14 = vmul.f32 0.001953125, %v547_v11  ;;  %v550_v15 = vmul.f32 0.001953125, %v549_v12  ;;  %v564_v25 = vld [vmem:[%s1451_s4] sm:$0xf]  ;;  %vm610_vm2 = vcmask 1043456  }
 0x1f4   : > { %v566_v29 = vld [vmem:[%s1452_s5] sm:$0xf] }
 0x1f5   : > { %v551_v16 = vmul.f32 %v548_v14, %v548_v14  ;;  %v585_v31 = vld [vmem:[%s1333_s30] sm:$0xff] }
 0x1f6   : > { %vm586_vm15 = vcmp.eq.f32.partialorder %v585_v31, 0.0  ;;  %vm587_vm0 = vcmp.eq.f32.partialorder %v585_v31, 255.0 }
 0x1f7   : > { %v552_v17 = vsub.f32 %v550_v15, %v551_v16  ;;  %vm588_vm1 = vmor %vm586_vm15, %vm587_vm0 }
 0x1f8   : > { %v761_v33 = vsel %vm588_vm1, 1.0, %v1131_v32 }
 0x1f9   : > { %v553_v18 = vadd.f32 1e-05, %v552_v17  ;;  %592 = vst [vmem:[#allocation1] ss:$2 sm:$0xff] %v761_v33 }
 0x1fb   : > { %931 = vrsqrt.f32 %v553_v18  ;;  %vm560_vm12 = vweird.f32 %v553_v18 }
 0x200   : > { %v593_v34 = vld.sshfl [vmem:[#allocation1] sm:$0xff pattern:$0x75316420]  ;;  %v594_v35 = vld.sshfl [vmem:[#allocation1 + $0x8] sm:$0xff pattern:$0x75316420] }
 0x201   : > { %v932_v19 = vpop.eup %931  ;;  %600 = vst [vmem:[#allocation1] ss:$2 sm:$0xff] %v585_v31 }
 0x202   : > { %v555_v20 = vmul.f32 %v932_v19, %v553_v18  ;;  %vm561_vm13 = vweird.f32 %v932_v19 }
 0x203   : > { %vm562_vm14 = vmor %vm560_vm12, %vm561_vm13 }
 0x204   : > { %v556_v21 = vmul.f32 %v932_v19, %v555_v20 }
 0x206   : > { %v557_v22 = vmul.f32 0.5, %v556_v21 }
 0x208   : > { %v558_v23 = vsub.f32 1.5, %v557_v22  ;;  %v602_v44 = vld.sshfl [vmem:[#allocation1 + $0x8] sm:$0xff pattern:$0x75316420] }
 0x209   : > { %v601_v47 = vld.sshfl [vmem:[#allocation1] sm:$0xff pattern:$0x75316420] }
 0x20a   : > { %v559_v24 = vmul.f32 %v932_v19, %v558_v23 }
 0x20c   : > { %v563_v26 = vsel %vm562_vm14, %v932_v19, %v559_v24 }
 0x20d   : > { %v565_v27 = vmul.f32 %v564_v25, %v563_v26 }
 0x20f   : > { %571 = vperm.xlu0 %930, %v565_v27   ;;  %v567_v28 = vmul.f32 %v565_v27, %v548_v14 }
 0x211   : > { %v568_v30 = vsub.f32 %v566_v29, %v567_v28 }
 0x217   : > { %578 = vperm.xlu0 %930, %v568_v30  }
 0x281   : > { %v572_v36 = vpop.permute.xlu0 %571 }
 0x282   : > { %v574_v37 = vmul.f32 %v572_v36, %v1364_v53  ;;  %v575_v38 = vmul.f32 %v572_v36, %v1366_v54 }
 0x289   : > { %v579_v39 = vpop.permute.xlu0 %578 }
 0x28a   : > { %v581_v40 = vadd.f32 %v579_v39, %v574_v37  ;;  %v582_v41 = vadd.f32 %v579_v39, %v575_v38 }
 0x28c   : > { %v583_v42 = vmax.f32 %v581_v40, 0.0  ;;  %v584_v43 = vmax.f32 %v582_v41, 0.0 }
 0x28e   : > { %v597_v45 = vmul.f32 %v593_v34, %v583_v42  ;;  %v598_v46 = vmul.f32 %v594_v35, %v584_v43 }
 0x290   : > { %v606_v48 = vadd.f32 %v602_v44, %v598_v46  ;;  %v605_v49 = vadd.f32 %v601_v47, %v597_v45 }
 0x292   : > { %v609_v50 = vrot.slane %v606_v48, 4 }
 0x294   : > { %v611_v51 = vsel %vm610_vm2, %v605_v49, %v609_v50 }
 0x295   : > { %613 = vst [vmem:[%s1370_s24] sm:$0xff] %v611_v51 }
 0x296 PF: > { %s622_s30 = smul.u32 %s1103_s27, %s1107_s28  ;;  %s629_s17 = sshll.u32 %s1370_s24, 4  ;;  %s630_s17 = int_to_ptr.vmem [resolvable:$true] %s629_s17 }
 0x297   : > { %s615_s19 = scalar_lea.sflag [#allocation6], %s1327_s26  ;;  %s1013_s27 = scalar_lea.hbm %s1453_s6, 24 }
 0x298   : > { %s768_s0 = sshll.u32 %s622_s30, 3 }
 0x299   : > { %s627_s29 = scalar_lea.hbm %s1453_s6, %s768_s0 }
 0x29a   : > { %s631_s9 = sshll.u32 %s627_s29, 4  ;;  %s632_s9 = int_to_ptr.hbm [resolvable:$true] %s631_s9 }
 0x29b   : > { %s1007_s13 = sshra.s32 %s632_s9, 4  ;;  %s1008_s13 = int_to_ptr.hbm [resolvable:$true] %s1007_s13 }
 0x29c   : > { %s1009_s12 = scalar_lea.hbm %s1008_s13, 8  ;;  %p1014_p9 = scmp.lt.s32.totalorder %s1008_s13, %s1453_s6 }
 0x29d   : > { %p1010_p5 = scmp.ne.s32.totalorder %s1008_s13, %s1009_s12  ;;  %p1015_p10 = scmp.lt.s32.totalorder %s1013_s27, %s1009_s12 }
 0x29f   : > { %p1011_p0 = pnand %p1010_p5, %p1300_p12  ;;  %p1016_p4 = por %p1015_p10, %p1014_p9 }
 0x2a1   : > { %p1012_p8 = pneg %p1011_p0 }
 0x2a3   : > { %p1017_p6 = pnand %p1016_p4, %p1012_p8 }
 0x2a5   : > { %1020 = shalt.err (!%p1017_p6)
}
 0x2a6   : > { %776 = dma.vmem_to_hbm [thread:$0]  (%p1300_p12), %s630_s17, 128, %s632_s9, %s615_s19  }
 0x2a7 PF: > { %s1481_s26 = sld [smem:[#allocation13_spill]]  ;;  %p790_p7 = scmp.ge.s32.totalorder %s1119_s7, 2 }
 0x2a9   : > { %p786_p11 = pnand %p790_p7, %p1304_p2 }
 0x2ab   : > { %p787_p13 = pneg %p786_p11 }
 0x2ad   : > { %s643_s15 = sand.u32 1, %s1481_s26  }
 0x2ae   : > { %s644_s8 = scalar_lea.sflag [#allocation6], %s643_s15 }
 0x2af   : > { %1074 = dma.done.wait (%p787_p13), %s644_s8, 128  }
 0x2b0   : > { %1076 = vsyncadd (%p787_p13), %s644_s8, 4294967168  ;;  %s25_s7 = sadd.s32 1, %s1119_s7   ;;  %s1482_s20 = sld [smem:[#allocation20_spill]] }
 0x2b1   : > { %p22_p1 = scmp.ge.s32.totalorder %s25_s7, 8   ;;  %s1483_s18 = sld [smem:[#allocation14_spill]] }
 0x2b2   : > { %s1484_s26 = sld [smem:[#allocation19_spill]]  ;;  %s1489_s21 = smov %s1083_s22 }
 0x2b3   : > { %s1485_s27 = sld [smem:[#allocation15_spill]]  ;;  %s1490_s22 = smov %s1087_s23 }
 0x2b4   : > { %s1486_s28 = sld [smem:[#allocation16_spill]]  ;;  %s1492_s24 = smov %s1095_s25 }
 0x2b5   : > { %s1487_s29 = sld [smem:[#allocation17_spill]]  ;;  %24 = sbr.rel (!%p22_p1) target bundleno = 13 (0xd), region = 117 }
 0x2b6   : > { %s1488_s30 = sld [smem:[#allocation18_spill]]  ;;  %s1491_s23 = smov %s1482_s20 }
 0x2b7   : > { %s1493_s25 = smov %s1483_s18 }
 0x2ba   :  { %650 = vsyncpa [#allocation5], 1 }
 0x2bb   :  { %652 = vsyncpa [#allocation5 + $0x1], 1 }
 0x2bc   :  { %653 = vsyncpa [#allocation8], 1 }
 0x2bd   :  { %655 = vsyncpa [#allocation8 + $0x1], 1 }
 0x2be   :  { %656 = vsyncpa [#allocation6], 1 }
 0x2bf   :  { %658 = vsyncpa [#allocation6 + $0x1], 1 }

</bundles_post_ra>
